<compile_context>
chip_gen: v6e
topology: v6e:2x2x1
jax: 0.10.0
libtpu: 0.0.40
codegen_flags: <defaults>
</compile_context>

<pallas_src>
import functools

import jax
import jax.numpy as jnp
from jax import lax
from jax.experimental import pallas as pl


def _round_up(x, m):
    return ((x + m - 1) // m) * m


def _triu_to_symmetric_kernel(probs_ref, out_ref, *, n):
    """Reconstruct the symmetric (S, S) matrix (zero padded past n) from triu values.

    probs_ref: (1, T_buf) f32  -- flattened upper-triangular values, zero padded
    out_ref:   (S, S) f32      -- S = round_up(n, 128); valid region is [:n, :n]
    """
    s = out_ref.shape[0]
    col = lax.broadcasted_iota(jnp.int32, (1, s), 1)

    # Zero-init (padding rows/cols stay zero), then fill the upper triangle row by row.
    # Row i of U is a contiguous slice of probs: U[i, j] = probs[start(i) + j] for j >= i.
    out_ref[...] = jnp.zeros((s, s), jnp.float32)
    for i in range(n):
        start = i * n - (i * (i - 1)) // 2 - i        # static per-row offset
        vals = probs_ref[0:1, start:start + s]        # contiguous static lane slice
        out_ref[i:i + 1, :] = jnp.where((col >= i) & (col < n), vals, 0.0)

    # Symmetrize: out = U + U.T - diag(U).  Transpose runs on the XLU; the rest is VPU.
    u = out_ref[...]
    ri = lax.broadcasted_iota(jnp.int32, (s, s), 0)
    ci = lax.broadcasted_iota(jnp.int32, (s, s), 1)
    out_ref[...] = u + u.T - jnp.where(ri == ci, u, 0.0)


@functools.partial(jax.jit, static_argnames=("n", "directed"))
def bernoulli_graph_forward(probs, n, directed=False):
    """JAX/Pallas equivalent of BernoulliGraphModel.forward().

    probs: if directed  -> (n, n) f32 matrix parameter
           if undirected-> (n*(n+1)//2,) f32 flattened triu values parameter
    """
    if directed:
        # forward() just returns the (n, n) parameter matrix; no kernel / copy needed.
        return probs.astype(jnp.float32)

    t = n * (n + 1) // 2
    s = _round_up(n, 128)                    # lane-dense padded output size
    # Row i's slice reads probs[start(i) : start(i) + s]; max start is t - n, so pad the
    # buffer to at least t - n + s lanes (rounded up to a full vreg lane multiple).
    t_buf = _round_up(t - n + s, 128)
    probs_pad = jnp.zeros((1, t_buf), jnp.float32).at[0, :t].set(probs.astype(jnp.float32))

    out_pad = pl.pallas_call(
        functools.partial(_triu_to_symmetric_kernel, n=n),
        out_shape=jax.ShapeDtypeStruct((s, s), jnp.float32),
        in_specs=[pl.BlockSpec((1, t_buf), lambda: (0, 0))],
        out_specs=pl.BlockSpec((s, s), lambda: (0, 0)),
    )(probs_pad)
    return out_pad[:n, :n]


def _reference_triu_to_symmetric(probs, n):
    iu = jnp.triu_indices(n)
    m = jnp.zeros((n, n), jnp.float32).at[iu].set(probs)
    return m + m.T - jnp.diag(jnp.diag(m))


if __name__ == "__main__":
    N = 16  # number of graph nodes

    # Deterministic synthetic "init_matrix": a symmetric matrix of probabilities in [0, 1].
    key = jax.random.PRNGKey(0)
    a = jax.random.uniform(key, (N, N), dtype=jnp.float32)
    init_matrix = jnp.clip(0.5 * (a + a.T), 0.0, 1.0)

    # Parameter setup (glue, mirrors __init__): undirected model stores flattened triu values.
    iu = jnp.triu_indices(N)
    probs_param = init_matrix[iu]  # shape (N*(N+1)//2,) = (136,)

    # Undirected forward: reconstruct the symmetric matrix in the Pallas kernel.
    out = bernoulli_graph_forward(probs_param, N, directed=False)
    out = jax.block_until_ready(out)

    ref = _reference_triu_to_symmetric(probs_param, N)
    assert out.shape == (N, N) and out.dtype == jnp.float32
    assert jnp.allclose(out, ref, atol=1e-6), "kernel output mismatch vs reference"
    assert jnp.allclose(out, out.T, atol=1e-6), "output not symmetric"

    # Directed forward: the parameter matrix itself (pure pass-through, no kernel).
    out_dir = bernoulli_graph_forward(init_matrix, N, directed=True)
    out_dir = jax.block_until_ready(out_dir)
    assert jnp.allclose(out_dir, init_matrix, atol=1e-6)

    # TODO(synk): sample()/statistics()/project_parameters() (Bernoulli sampling, scalar
    # reporting, parameter clamping) are training/host-side utilities, not forward-path ops.
    print("KERNEL_OK")
</pallas_src>

<mosaic_0001>
module attributes {stable_mosaic.version = 11 : i64} {
  func.func @_triu_to_symmetric_kernel(%arg0: memref<1x256xf32, #tpu.memory_space<vmem>>, %arg1: memref<128x128xf32, #tpu.memory_space<vmem>>) attributes {dimension_semantics = [], scalar_prefetch = 0 : i64, scratch_operands = 0 : i64, tpu.core_type = #tpu.core_type<tc>} {
    %0 = tpu.iota {dimensions = array<i32: 1>} : vector<1x128xi32>
    %cst = arith.constant 0.000000e+00 : f32
    %1 = vector.broadcast %cst : f32 to vector<128x128xf32>
    %c0 = arith.constant 0 : index
    %c0_0 = arith.constant 0 : index
    %2 = vector.load %arg1[%c0, %c0_0] : memref<128x128xf32, #tpu.memory_space<vmem>>, vector<128x128xf32>
    tpu.vector_store %arg1[%c0, %c0_0], %1 {strides = array<i32>} : memref<128x128xf32, #tpu.memory_space<vmem>>, vector<128x128xf32>,
    %c0_1 = arith.constant 0 : index
    %c0_2 = arith.constant 0 : index
    %3 = vector.load %arg0[%c0_1, %c0_2] : memref<1x256xf32, #tpu.memory_space<vmem>>, vector<1x128xf32>
    %c0_i32 = arith.constant 0 : i32
    %4 = vector.broadcast %c0_i32 : i32 to vector<1x128xi32>
    %5 = arith.cmpi sge, %0, %4 : vector<1x128xi32>
    %c16_i32 = arith.constant 16 : i32
    %6 = vector.broadcast %c16_i32 : i32 to vector<1x128xi32>
    %7 = arith.cmpi slt, %0, %6 : vector<1x128xi32>
    %8 = arith.andi %5, %7 : vector<1x128xi1>
    %cst_3 = arith.constant 0.000000e+00 : f32
    %9 = vector.broadcast %cst_3 : f32 to vector<1x128xf32>
    %10 = arith.select %8, %3, %9 : vector<1x128xi1>, vector<1x128xf32>
    %c0_4 = arith.constant 0 : index
    %c0_5 = arith.constant 0 : index
    %11 = vector.load %arg1[%c0_4, %c0_5] : memref<128x128xf32, #tpu.memory_space<vmem>>, vector<1x128xf32>
    tpu.vector_store %arg1[%c0_4, %c0_5], %10 {strides = array<i32>} : memref<128x128xf32, #tpu.memory_space<vmem>>, vector<1x128xf32>,
    %c0_6 = arith.constant 0 : index
    %c15 = arith.constant 15 : index
    %12 = vector.load %arg0[%c0_6, %c15] : memref<1x256xf32, #tpu.memory_space<vmem>>, vector<1x128xf32>
    %c1_i32 = arith.constant 1 : i32
    %13 = vector.broadcast %c1_i32 : i32 to vector<1x128xi32>
    %14 = arith.cmpi sge, %0, %13 : vector<1x128xi32>
    %c16_i32_7 = arith.constant 16 : i32
    %15 = vector.broadcast %c16_i32_7 : i32 to vector<1x128xi32>
    %16 = arith.cmpi slt, %0, %15 : vector<1x128xi32>
    %17 = arith.andi %14, %16 : vector<1x128xi1>
    %cst_8 = arith.constant 0.000000e+00 : f32
    %18 = vector.broadcast %cst_8 : f32 to vector<1x128xf32>
    %19 = arith.select %17, %12, %18 : vector<1x128xi1>, vector<1x128xf32>
    %c1 = arith.constant 1 : index
    %c0_9 = arith.constant 0 : index
    %20 = vector.load %arg1[%c1, %c0_9] : memref<128x128xf32, #tpu.memory_space<vmem>>, vector<1x128xf32>
    tpu.vector_store %arg1[%c1, %c0_9], %19 {strides = array<i32>} : memref<128x128xf32, #tpu.memory_space<vmem>>, vector<1x128xf32>,
    %c0_10 = arith.constant 0 : index
    %c29 = arith.constant 29 : index
    %21 = vector.load %arg0[%c0_10, %c29] : memref<1x256xf32, #tpu.memory_space<vmem>>, vector<1x128xf32>
    %c2_i32 = arith.constant 2 : i32
    %22 = vector.broadcast %c2_i32 : i32 to vector<1x128xi32>
    %23 = arith.cmpi sge, %0, %22 : vector<1x128xi32>
    %c16_i32_11 = arith.constant 16 : i32
    %24 = vector.broadcast %c16_i32_11 : i32 to vector<1x128xi32>
    %25 = arith.cmpi slt, %0, %24 : vector<1x128xi32>
    %26 = arith.andi %23, %25 : vector<1x128xi1>
    %cst_12 = arith.constant 0.000000e+00 : f32
    %27 = vector.broadcast %cst_12 : f32 to vector<1x128xf32>
    %28 = arith.select %26, %21, %27 : vector<1x128xi1>, vector<1x128xf32>
    %c2 = arith.constant 2 : index
    %c0_13 = arith.constant 0 : index
    %29 = vector.load %arg1[%c2, %c0_13] : memref<128x128xf32, #tpu.memory_space<vmem>>, vector<1x128xf32>
    tpu.vector_store %arg1[%c2, %c0_13], %28 {strides = array<i32>} : memref<128x128xf32, #tpu.memory_space<vmem>>, vector<1x128xf32>,
    %c0_14 = arith.constant 0 : index
    %c42 = arith.constant 42 : index
    %30 = vector.load %arg0[%c0_14, %c42] : memref<1x256xf32, #tpu.memory_space<vmem>>, vector<1x128xf32>
    %c3_i32 = arith.constant 3 : i32
    %31 = vector.broadcast %c3_i32 : i32 to vector<1x128xi32>
    %32 = arith.cmpi sge, %0, %31 : vector<1x128xi32>
    %c16_i32_15 = arith.constant 16 : i32
    %33 = vector.broadcast %c16_i32_15 : i32 to vector<1x128xi32>
    %34 = arith.cmpi slt, %0, %33 : vector<1x128xi32>
    %35 = arith.andi %32, %34 : vector<1x128xi1>
    %cst_16 = arith.constant 0.000000e+00 : f32
    %36 = vector.broadcast %cst_16 : f32 to vector<1x128xf32>
    %37 = arith.select %35, %30, %36 : vector<1x128xi1>, vector<1x128xf32>
    %c3 = arith.constant 3 : index
    %c0_17 = arith.constant 0 : index
    %38 = vector.load %arg1[%c3, %c0_17] : memref<128x128xf32, #tpu.memory_space<vmem>>, vector<1x128xf32>
    tpu.vector_store %arg1[%c3, %c0_17], %37 {strides = array<i32>} : memref<128x128xf32, #tpu.memory_space<vmem>>, vector<1x128xf32>,
    %c0_18 = arith.constant 0 : index
    %c54 = arith.constant 54 : index
    %39 = vector.load %arg0[%c0_18, %c54] : memref<1x256xf32, #tpu.memory_space<vmem>>, vector<1x128xf32>
    %c4_i32 = arith.constant 4 : i32
    %40 = vector.broadcast %c4_i32 : i32 to vector<1x128xi32>
    %41 = arith.cmpi sge, %0, %40 : vector<1x128xi32>
    %c16_i32_19 = arith.constant 16 : i32
    %42 = vector.broadcast %c16_i32_19 : i32 to vector<1x128xi32>
    %43 = arith.cmpi slt, %0, %42 : vector<1x128xi32>
    %44 = arith.andi %41, %43 : vector<1x128xi1>
    %cst_20 = arith.constant 0.000000e+00 : f32
    %45 = vector.broadcast %cst_20 : f32 to vector<1x128xf32>
    %46 = arith.select %44, %39, %45 : vector<1x128xi1>, vector<1x128xf32>
    %c4 = arith.constant 4 : index
    %c0_21 = arith.constant 0 : index
    %47 = vector.load %arg1[%c4, %c0_21] : memref<128x128xf32, #tpu.memory_space<vmem>>, vector<1x128xf32>
    tpu.vector_store %arg1[%c4, %c0_21], %46 {strides = array<i32>} : memref<128x128xf32, #tpu.memory_space<vmem>>, vector<1x128xf32>,
    %c0_22 = arith.constant 0 : index
    %c65 = arith.constant 65 : index
    %48 = vector.load %arg0[%c0_22, %c65] : memref<1x256xf32, #tpu.memory_space<vmem>>, vector<1x128xf32>
    %c5_i32 = arith.constant 5 : i32
    %49 = vector.broadcast %c5_i32 : i32 to vector<1x128xi32>
    %50 = arith.cmpi sge, %0, %49 : vector<1x128xi32>
    %c16_i32_23 = arith.constant 16 : i32
    %51 = vector.broadcast %c16_i32_23 : i32 to vector<1x128xi32>
    %52 = arith.cmpi slt, %0, %51 : vector<1x128xi32>
    %53 = arith.andi %50, %52 : vector<1x128xi1>
    %cst_24 = arith.constant 0.000000e+00 : f32
    %54 = vector.broadcast %cst_24 : f32 to vector<1x128xf32>
    %55 = arith.select %53, %48, %54 : vector<1x128xi1>, vector<1x128xf32>
    %c5 = arith.constant 5 : index
    %c0_25 = arith.constant 0 : index
    %56 = vector.load %arg1[%c5, %c0_25] : memref<128x128xf32, #tpu.memory_space<vmem>>, vector<1x128xf32>
    tpu.vector_store %arg1[%c5, %c0_25], %55 {strides = array<i32>} : memref<128x128xf32, #tpu.memory_space<vmem>>, vector<1x128xf32>,
    %c0_26 = arith.constant 0 : index
    %c75 = arith.constant 75 : index
    %57 = vector.load %arg0[%c0_26, %c75] : memref<1x256xf32, #tpu.memory_space<vmem>>, vector<1x128xf32>
    %c6_i32 = arith.constant 6 : i32
    %58 = vector.broadcast %c6_i32 : i32 to vector<1x128xi32>
    %59 = arith.cmpi sge, %0, %58 : vector<1x128xi32>
    %c16_i32_27 = arith.constant 16 : i32
    %60 = vector.broadcast %c16_i32_27 : i32 to vector<1x128xi32>
    %61 = arith.cmpi slt, %0, %60 : vector<1x128xi32>
    %62 = arith.andi %59, %61 : vector<1x128xi1>
    %cst_28 = arith.constant 0.000000e+00 : f32
    %63 = vector.broadcast %cst_28 : f32 to vector<1x128xf32>
    %64 = arith.select %62, %57, %63 : vector<1x128xi1>, vector<1x128xf32>
    %c6 = arith.constant 6 : index
    %c0_29 = arith.constant 0 : index
    %65 = vector.load %arg1[%c6, %c0_29] : memref<128x128xf32, #tpu.memory_space<vmem>>, vector<1x128xf32>
    tpu.vector_store %arg1[%c6, %c0_29], %64 {strides = array<i32>} : memref<128x128xf32, #tpu.memory_space<vmem>>, vector<1x128xf32>,
    %c0_30 = arith.constant 0 : index
    %c84 = arith.constant 84 : index
    %66 = vector.load %arg0[%c0_30, %c84] : memref<1x256xf32, #tpu.memory_space<vmem>>, vector<1x128xf32>
    %c7_i32 = arith.constant 7 : i32
    %67 = vector.broadcast %c7_i32 : i32 to vector<1x128xi32>
    %68 = arith.cmpi sge, %0, %67 : vector<1x128xi32>
    %c16_i32_31 = arith.constant 16 : i32
    %69 = vector.broadcast %c16_i32_31 : i32 to vector<1x128xi32>
    %70 = arith.cmpi slt, %0, %69 : vector<1x128xi32>
    %71 = arith.andi %68, %70 : vector<1x128xi1>
    %cst_32 = arith.constant 0.000000e+00 : f32
    %72 = vector.broadcast %cst_32 : f32 to vector<1x128xf32>
    %73 = arith.select %71, %66, %72 : vector<1x128xi1>, vector<1x128xf32>
    %c7 = arith.constant 7 : index
    %c0_33 = arith.constant 0 : index
    %74 = vector.load %arg1[%c7, %c0_33] : memref<128x128xf32, #tpu.memory_space<vmem>>, vector<1x128xf32>
    tpu.vector_store %arg1[%c7, %c0_33], %73 {strides = array<i32>} : memref<128x128xf32, #tpu.memory_space<vmem>>, vector<1x128xf32>,
    %c0_34 = arith.constant 0 : index
    %c92 = arith.constant 92 : index
    %75 = vector.load %arg0[%c0_34, %c92] : memref<1x256xf32, #tpu.memory_space<vmem>>, vector<1x128xf32>
    %c8_i32 = arith.constant 8 : i32
    %76 = vector.broadcast %c8_i32 : i32 to vector<1x128xi32>
    %77 = arith.cmpi sge, %0, %76 : vector<1x128xi32>
    %c16_i32_35 = arith.constant 16 : i32
    %78 = vector.broadcast %c16_i32_35 : i32 to vector<1x128xi32>
    %79 = arith.cmpi slt, %0, %78 : vector<1x128xi32>
    %80 = arith.andi %77, %79 : vector<1x128xi1>
    %cst_36 = arith.constant 0.000000e+00 : f32
    %81 = vector.broadcast %cst_36 : f32 to vector<1x128xf32>
    %82 = arith.select %80, %75, %81 : vector<1x128xi1>, vector<1x128xf32>
    %c8 = arith.constant 8 : index
    %c0_37 = arith.constant 0 : index
    %83 = vector.load %arg1[%c8, %c0_37] : memref<128x128xf32, #tpu.memory_space<vmem>>, vector<1x128xf32>
    tpu.vector_store %arg1[%c8, %c0_37], %82 {strides = array<i32>} : memref<128x128xf32, #tpu.memory_space<vmem>>, vector<1x128xf32>,
    %c0_38 = arith.constant 0 : index
    %c99 = arith.constant 99 : index
    %84 = vector.load %arg0[%c0_38, %c99] : memref<1x256xf32, #tpu.memory_space<vmem>>, vector<1x128xf32>
    %c9_i32 = arith.constant 9 : i32
    %85 = vector.broadcast %c9_i32 : i32 to vector<1x128xi32>
    %86 = arith.cmpi sge, %0, %85 : vector<1x128xi32>
    %c16_i32_39 = arith.constant 16 : i32
    %87 = vector.broadcast %c16_i32_39 : i32 to vector<1x128xi32>
    %88 = arith.cmpi slt, %0, %87 : vector<1x128xi32>
    %89 = arith.andi %86, %88 : vector<1x128xi1>
    %cst_40 = arith.constant 0.000000e+00 : f32
    %90 = vector.broadcast %cst_40 : f32 to vector<1x128xf32>
    %91 = arith.select %89, %84, %90 : vector<1x128xi1>, vector<1x128xf32>
    %c9 = arith.constant 9 : index
    %c0_41 = arith.constant 0 : index
    %92 = vector.load %arg1[%c9, %c0_41] : memref<128x128xf32, #tpu.memory_space<vmem>>, vector<1x128xf32>
    tpu.vector_store %arg1[%c9, %c0_41], %91 {strides = array<i32>} : memref<128x128xf32, #tpu.memory_space<vmem>>, vector<1x128xf32>,
    %c0_42 = arith.constant 0 : index
    %c105 = arith.constant 105 : index
    %93 = vector.load %arg0[%c0_42, %c105] : memref<1x256xf32, #tpu.memory_space<vmem>>, vector<1x128xf32>
    %c10_i32 = arith.constant 10 : i32
    %94 = vector.broadcast %c10_i32 : i32 to vector<1x128xi32>
    %95 = arith.cmpi sge, %0, %94 : vector<1x128xi32>
    %c16_i32_43 = arith.constant 16 : i32
    %96 = vector.broadcast %c16_i32_43 : i32 to vector<1x128xi32>
    %97 = arith.cmpi slt, %0, %96 : vector<1x128xi32>
    %98 = arith.andi %95, %97 : vector<1x128xi1>
    %cst_44 = arith.constant 0.000000e+00 : f32
    %99 = vector.broadcast %cst_44 : f32 to vector<1x128xf32>
    %100 = arith.select %98, %93, %99 : vector<1x128xi1>, vector<1x128xf32>
    %c10 = arith.constant 10 : index
    %c0_45 = arith.constant 0 : index
    %101 = vector.load %arg1[%c10, %c0_45] : memref<128x128xf32, #tpu.memory_space<vmem>>, vector<1x128xf32>
    tpu.vector_store %arg1[%c10, %c0_45], %100 {strides = array<i32>} : memref<128x128xf32, #tpu.memory_space<vmem>>, vector<1x128xf32>,
    %c0_46 = arith.constant 0 : index
    %c110 = arith.constant 110 : index
    %102 = vector.load %arg0[%c0_46, %c110] : memref<1x256xf32, #tpu.memory_space<vmem>>, vector<1x128xf32>
    %c11_i32 = arith.constant 11 : i32
    %103 = vector.broadcast %c11_i32 : i32 to vector<1x128xi32>
    %104 = arith.cmpi sge, %0, %103 : vector<1x128xi32>
    %c16_i32_47 = arith.constant 16 : i32
    %105 = vector.broadcast %c16_i32_47 : i32 to vector<1x128xi32>
    %106 = arith.cmpi slt, %0, %105 : vector<1x128xi32>
    %107 = arith.andi %104, %106 : vector<1x128xi1>
    %cst_48 = arith.constant 0.000000e+00 : f32
    %108 = vector.broadcast %cst_48 : f32 to vector<1x128xf32>
    %109 = arith.select %107, %102, %108 : vector<1x128xi1>, vector<1x128xf32>
    %c11 = arith.constant 11 : index
    %c0_49 = arith.constant 0 : index
    %110 = vector.load %arg1[%c11, %c0_49] : memref<128x128xf32, #tpu.memory_space<vmem>>, vector<1x128xf32>
    tpu.vector_store %arg1[%c11, %c0_49], %109 {strides = array<i32>} : memref<128x128xf32, #tpu.memory_space<vmem>>, vector<1x128xf32>,
    %c0_50 = arith.constant 0 : index
    %c114 = arith.constant 114 : index
    %111 = vector.load %arg0[%c0_50, %c114] : memref<1x256xf32, #tpu.memory_space<vmem>>, vector<1x128xf32>
    %c12_i32 = arith.constant 12 : i32
    %112 = vector.broadcast %c12_i32 : i32 to vector<1x128xi32>
    %113 = arith.cmpi sge, %0, %112 : vector<1x128xi32>
    %c16_i32_51 = arith.constant 16 : i32
    %114 = vector.broadcast %c16_i32_51 : i32 to vector<1x128xi32>
    %115 = arith.cmpi slt, %0, %114 : vector<1x128xi32>
    %116 = arith.andi %113, %115 : vector<1x128xi1>
    %cst_52 = arith.constant 0.000000e+00 : f32
    %117 = vector.broadcast %cst_52 : f32 to vector<1x128xf32>
    %118 = arith.select %116, %111, %117 : vector<1x128xi1>, vector<1x128xf32>
    %c12 = arith.constant 12 : index
    %c0_53 = arith.constant 0 : index
    %119 = vector.load %arg1[%c12, %c0_53] : memref<128x128xf32, #tpu.memory_space<vmem>>, vector<1x128xf32>
    tpu.vector_store %arg1[%c12, %c0_53], %118 {strides = array<i32>} : memref<128x128xf32, #tpu.memory_space<vmem>>, vector<1x128xf32>,
    %c0_54 = arith.constant 0 : index
    %c117 = arith.constant 117 : index
    %120 = vector.load %arg0[%c0_54, %c117] : memref<1x256xf32, #tpu.memory_space<vmem>>, vector<1x128xf32>
    %c13_i32 = arith.constant 13 : i32
    %121 = vector.broadcast %c13_i32 : i32 to vector<1x128xi32>
    %122 = arith.cmpi sge, %0, %121 : vector<1x128xi32>
    %c16_i32_55 = arith.constant 16 : i32
    %123 = vector.broadcast %c16_i32_55 : i32 to vector<1x128xi32>
    %124 = arith.cmpi slt, %0, %123 : vector<1x128xi32>
    %125 = arith.andi %122, %124 : vector<1x128xi1>
    %cst_56 = arith.constant 0.000000e+00 : f32
    %126 = vector.broadcast %cst_56 : f32 to vector<1x128xf32>
    %127 = arith.select %125, %120, %126 : vector<1x128xi1>, vector<1x128xf32>
    %c13 = arith.constant 13 : index
    %c0_57 = arith.constant 0 : index
    %128 = vector.load %arg1[%c13, %c0_57] : memref<128x128xf32, #tpu.memory_space<vmem>>, vector<1x128xf32>
    tpu.vector_store %arg1[%c13, %c0_57], %127 {strides = array<i32>} : memref<128x128xf32, #tpu.memory_space<vmem>>, vector<1x128xf32>,
    %c0_58 = arith.constant 0 : index
    %c119 = arith.constant 119 : index
    %129 = vector.load %arg0[%c0_58, %c119] : memref<1x256xf32, #tpu.memory_space<vmem>>, vector<1x128xf32>
    %c14_i32 = arith.constant 14 : i32
    %130 = vector.broadcast %c14_i32 : i32 to vector<1x128xi32>
    %131 = arith.cmpi sge, %0, %130 : vector<1x128xi32>
    %c16_i32_59 = arith.constant 16 : i32
    %132 = vector.broadcast %c16_i32_59 : i32 to vector<1x128xi32>
    %133 = arith.cmpi slt, %0, %132 : vector<1x128xi32>
    %134 = arith.andi %131, %133 : vector<1x128xi1>
    %cst_60 = arith.constant 0.000000e+00 : f32
    %135 = vector.broadcast %cst_60 : f32 to vector<1x128xf32>
    %136 = arith.select %134, %129, %135 : vector<1x128xi1>, vector<1x128xf32>
    %c14 = arith.constant 14 : index
    %c0_61 = arith.constant 0 : index
    %137 = vector.load %arg1[%c14, %c0_61] : memref<128x128xf32, #tpu.memory_space<vmem>>, vector<1x128xf32>
    tpu.vector_store %arg1[%c14, %c0_61], %136 {strides = array<i32>} : memref<128x128xf32, #tpu.memory_space<vmem>>, vector<1x128xf32>,
    %c0_62 = arith.constant 0 : index
    %c120 = arith.constant 120 : index
    %138 = vector.load %arg0[%c0_62, %c120] : memref<1x256xf32, #tpu.memory_space<vmem>>, vector<1x128xf32>
    %c15_i32 = arith.constant 15 : i32
    %139 = vector.broadcast %c15_i32 : i32 to vector<1x128xi32>
    %140 = arith.cmpi sge, %0, %139 : vector<1x128xi32>
    %c16_i32_63 = arith.constant 16 : i32
    %141 = vector.broadcast %c16_i32_63 : i32 to vector<1x128xi32>
    %142 = arith.cmpi slt, %0, %141 : vector<1x128xi32>
    %143 = arith.andi %140, %142 : vector<1x128xi1>
    %cst_64 = arith.constant 0.000000e+00 : f32
    %144 = vector.broadcast %cst_64 : f32 to vector<1x128xf32>
    %145 = arith.select %143, %138, %144 : vector<1x128xi1>, vector<1x128xf32>
    %c15_65 = arith.constant 15 : index
    %c0_66 = arith.constant 0 : index
    %146 = vector.load %arg1[%c15_65, %c0_66] : memref<128x128xf32, #tpu.memory_space<vmem>>, vector<1x128xf32>
    tpu.vector_store %arg1[%c15_65, %c0_66], %145 {strides = array<i32>} : memref<128x128xf32, #tpu.memory_space<vmem>>, vector<1x128xf32>,
    %c0_67 = arith.constant 0 : index
    %c0_68 = arith.constant 0 : index
    %147 = vector.load %arg1[%c0_67, %c0_68] : memref<128x128xf32, #tpu.memory_space<vmem>>, vector<128x128xf32>
    %148 = tpu.iota {dimensions = array<i32: 0>} : vector<128x128xi32>
    %149 = tpu.iota {dimensions = array<i32: 1>} : vector<128x128xi32>
    %150 = tpu.transpose %147, [1, 0] : vector<128x128xf32> -> vector<128x128xf32>
    %151 = arith.addf %147, %150 : vector<128x128xf32>
    %152 = arith.cmpi eq, %148, %149 : vector<128x128xi32>
    %cst_69 = arith.constant 0.000000e+00 : f32
    %153 = vector.broadcast %cst_69 : f32 to vector<128x128xf32>
    %154 = arith.select %152, %147, %153 : vector<128x128xi1>, vector<128x128xf32>
    %155 = arith.subf %151, %154 : vector<128x128xf32>
    %c0_70 = arith.constant 0 : index
    %c0_71 = arith.constant 0 : index
    %156 = vector.load %arg1[%c0_70, %c0_71] : memref<128x128xf32, #tpu.memory_space<vmem>>, vector<128x128xf32>
    tpu.vector_store %arg1[%c0_70, %c0_71], %155 {strides = array<i32>} : memref<128x128xf32, #tpu.memory_space<vmem>>, vector<128x128xf32>,
    return
  }
}

</mosaic_0001>

<bundles_post_ra>
// kernel: bernoulli_graph_forward.1
= control target key start
LH: loop header
LB: loop body
LE: loop exit
PB: predicated region body
PF: predicated region fallthrough
CT: control target
= control target key end

     0   :  { %v8_v0 = vlaneseq  ;;  %v512_v1 = vmov 0.0   ;;  %s513_s14 = smov 99   ;;  %s514_s15 = smov 113   ;;  %vm69_vm4 = vcmask 809984   ;;  %vm48_vm5 = vcmask 924672   ;;  %s807_s0 = inlined_call_operand.vmem [shape: f32[1,256], index: 0, kind: input, shape index: {}]   ;;  %s808_s1 = inlined_call_operand.vmem [shape: f32[128,128], index: 1, kind: output, shape index: {}]  }
   0x1   :  { %10 = vst [vmem:[%s808_s1] sm:$0xff] %v512_v1  ;;  %11 = vst [vmem:[%s808_s1 + $0x8] sm:$0xff] %v512_v1  ;;  %v53_v3 = vld [vmem:[%s807_s0] sm:$0x3]  ;;  %s515_s20 = smov 86   ;;  %s516_s25 = smov 74   ;;  %vm90_vm8 = vcmask 703488  }
   0x2   :  { %v546_v2 = vshrl.u32 %v8_v0, 7  ;;  %v32_v4 = vld [vmem:[%s807_s0] sm:$0x3]  ;;  %v572_v15 = vand.u32 127, %v8_v0  ;;  %s517_s30 = smov 63   ;;  %s518_s4 = smov 53  }
   0x3   :  { %v74_v11 = vld [vmem:[%s807_s0] sm:$0x3]  ;;  %s519_s7 = smov 44   ;;  %s520_s10 = smov 36   ;;  %vm111_vm11 = vcmask 605184   ;;  %vm132_vm14 = vcmask 515072  }
   0x4   :  { %v555_v5 = vsub.s32 0, %v546_v2  ;;  %v558_v6 = vsub.s32 1, %v546_v2  ;;  %v95_v14 = vld [vmem:[%s807_s0] sm:$0x3]  ;;  %vm28_vm0 = vcmp.lt.s32.totalorder %v572_v15, 16  ;;  %s521_s13 = smov 29  }
   0x5   :  { %v116_v18 = vld [vmem:[%s807_s0] sm:$0x3]  ;;  %s522_s16 = smov 23   ;;  %s523_s19 = smov 18   ;;  %vm54_vm1 = vcmp.ge.s32.totalorder %v572_v15, 2  ;;  %vm33_vm2 = vcmp.ge.s32.totalorder %v572_v15, 1 }
   0x6   :  { %v60_v7 = vrot.slane %v53_v3, %v555_v5  ;;  %v39_v8 = vrot.slane %v32_v4, %v555_v5  ;;  %v64_v9 = vrot.slane %v53_v3, %v558_v6  ;;  %v43_v10 = vrot.slane %v32_v4, %v558_v6  ;;  %v26_v19 = vld [vmem:[%s807_s0] sm:$0x1]  ;;  %s524_s22 = smov 14   ;;  %s526_s28 = smov 9   ;;  %vm55_vm3 = vmand %vm54_vm1, %vm28_vm0 }
   0x7   :  { %v85_v12 = vrot.slane %v74_v11, %v558_v6  ;;  %v81_v13 = vrot.slane %v74_v11, %v555_v5  ;;  %v106_v16 = vrot.slane %v95_v14, %v558_v6  ;;  %v102_v17 = vrot.slane %v95_v14, %v555_v5  ;;  %v137_v23 = vld [vmem:[%s807_s0] sm:$0x3]  ;;  %s527_s29 = smov 8   ;;  %vm34_vm6 = vmand %vm33_vm2, %vm28_vm0 }
   0x8   :  { %65 = vrot.lane.b32.xlu1 %v60_v7, %s513_s14  ;;  %44 = vrot.lane.b32.xlu0 %v39_v8, %s514_s15  ;;  %v127_v20 = vrot.slane %v116_v18, %v558_v6  ;;  %v123_v21 = vrot.slane %v116_v18, %v555_v5  ;;  %v30_v22 = vsel %vm28_vm0, %v26_v19, 0.0  ;;  %v148_v24 = vrot.slane %v137_v23, %v558_v6  ;;  %v158_v26 = vld [vmem:[%s807_s0] sm:$0x3] }
   0x9   :  { %31 = vst [vmem:[%s808_s1] sm:$0x1] %v30_v22  ;;  %v144_v25 = vrot.slane %v137_v23, %v555_v5  ;;  %v169_v27 = vrot.slane %v158_v26, %v558_v6  ;;  %v165_v28 = vrot.slane %v158_v26, %v555_v5  ;;  %v179_v29 = vld [vmem:[%s807_s0] sm:$0x3]  ;;  %vm75_vm7 = vcmp.ge.s32.totalorder %v572_v15, 3 }
   0xa   :  { %v190_v30 = vrot.slane %v179_v29, %v558_v6  ;;  %v186_v31 = vrot.slane %v179_v29, %v555_v5  ;;  %v200_v32 = vld [vmem:[%s807_s0] sm:$0x3]  ;;  %vm76_vm9 = vmand %vm75_vm7, %vm28_vm0  ;;  %vm96_vm10 = vcmp.ge.s32.totalorder %v572_v15, 4  ;;  %vm117_vm13 = vcmp.ge.s32.totalorder %v572_v15, 5 }
   0xb   :  { %v211_v33 = vrot.slane %v200_v32, %v558_v6  ;;  %v207_v34 = vrot.slane %v200_v32, %v555_v5  ;;  %v221_v35 = vld [vmem:[%s807_s0] sm:$0x3]  ;;  %vm97_vm12 = vmand %vm96_vm10, %vm28_vm0  ;;  %vm138_vm1 = vcmp.ge.s32.totalorder %v572_v15, 6  ;;  %vm153_vm2 = vcmask 433152  }
   0xc   :  { %67 = vrot.lane.b32.xlu1 %v64_v9, %s513_s14  ;;  %46 = vrot.lane.b32.xlu0 %v43_v10, %s514_s15  ;;  %v232_v36 = vrot.slane %v221_v35, %v558_v6  ;;  %v228_v37 = vrot.slane %v221_v35, %v555_v5  ;;  %v242_v38 = vld [vmem:[%s807_s0] sm:$0x3]  ;;  %vm118_vm15 = vmand %vm117_vm13, %vm28_vm0  ;;  %vm180_vm7 = vcmp.ge.s32.totalorder %v572_v15, 8  ;;  %vm201_vm10 = vcmp.ge.s32.totalorder %v572_v15, 9 }
   0xd   :  { %v253_v39 = vrot.slane %v242_v38, %v558_v6  ;;  %v249_v40 = vrot.slane %v242_v38, %v555_v5  ;;  %v263_v41 = vld [vmem:[%s807_s0] sm:$0x3]  ;;  %vm222_vm13 = vcmp.ge.s32.totalorder %v572_v15, 10 }
   0xe   :  { %v274_v42 = vrot.slane %v263_v41, %v558_v6  ;;  %v270_v43 = vrot.slane %v263_v41, %v555_v5  ;;  %v284_v44 = vld [vmem:[%s807_s0] sm:$0x3] }
   0xf   :  { %v295_v45 = vrot.slane %v284_v44, %v558_v6  ;;  %v291_v46 = vrot.slane %v284_v44, %v555_v5  ;;  %v305_v47 = vld [vmem:[%s807_s0] sm:$0x3] }
  0x10   :  { %88 = vrot.lane.b32.xlu1 %v85_v12, %s515_s20  ;;  %86 = vrot.lane.b32.xlu0 %v81_v13, %s515_s20  ;;  %v316_v48 = vrot.slane %v305_v47, %v558_v6  ;;  %v312_v49 = vrot.slane %v305_v47, %v555_v5  ;;  %v326_v50 = vld [vmem:[%s807_s0] sm:$0x3] }
  0x11   :  { %v337_v51 = vrot.slane %v326_v50, %v558_v6  ;;  %v333_v52 = vrot.slane %v326_v50, %v555_v5 }
  0x14   :  { %109 = vrot.lane.b32.xlu1 %v106_v16, %s516_s25  ;;  %107 = vrot.lane.b32.xlu0 %v102_v17, %s516_s25  ;;  %s525_s25 = smov 11  }
  0x18   :  { %130 = vrot.lane.b32.xlu1 %v127_v20, %s517_s30  ;;  %128 = vrot.lane.b32.xlu0 %v123_v21, %s517_s30 }
  0x1c   :  { %151 = vrot.lane.b32.xlu1 %v148_v24, %s518_s4  ;;  %149 = vrot.lane.b32.xlu0 %v144_v25, %s518_s4 }
  0x20   :  { %172 = vrot.lane.b32.xlu1 %v169_v27, %s519_s7  ;;  %170 = vrot.lane.b32.xlu0 %v165_v28, %s519_s7 }
  0x24   :  { %193 = vrot.lane.b32.xlu1 %v190_v30, %s520_s10  ;;  %191 = vrot.lane.b32.xlu0 %v186_v31, %s520_s10 }
  0x28   :  { %214 = vrot.lane.b32.xlu1 %v211_v33, %s521_s13  ;;  %212 = vrot.lane.b32.xlu0 %v207_v34, %s521_s13 }
  0x2c   :  { %235 = vrot.lane.b32.xlu1 %v232_v36, %s522_s16  ;;  %233 = vrot.lane.b32.xlu0 %v228_v37, %s522_s16 }
  0x30   :  { %256 = vrot.lane.b32.xlu1 %v253_v39, %s523_s19  ;;  %254 = vrot.lane.b32.xlu0 %v249_v40, %s523_s19 }
  0x34   :  { %277 = vrot.lane.b32.xlu1 %v274_v42, %s524_s22  ;;  %275 = vrot.lane.b32.xlu0 %v270_v43, %s524_s22 }
  0x38   :  { %298 = vrot.lane.b32.xlu1 %v295_v45, %s525_s25  ;;  %296 = vrot.lane.b32.xlu0 %v291_v46, %s525_s25 }
  0x3c   :  { %319 = vrot.lane.b32.xlu1 %v316_v48, %s526_s28  ;;  %317 = vrot.lane.b32.xlu0 %v312_v49, %s526_s28 }
  0x40   :  { %340 = vrot.lane.b32.xlu1 %v337_v51, %s527_s29  ;;  %338 = vrot.lane.b32.xlu0 %v333_v52, %s527_s29 }
  0x7a   :  { %v66_v53 = vpop.permute.xlu1 %65  ;;  %v45_v54 = vpop.permute.xlu0 %44 }
  0x7e   :  { %v68_v55 = vpop.permute.xlu1 %67  ;;  %v47_v56 = vpop.permute.xlu0 %46 }
  0x7f   :  { %v70_v57 = vsel %vm69_vm4, %v66_v53, %v68_v55  ;;  %v49_v58 = vsel %vm48_vm5, %v45_v54, %v47_v56  ;;  %vm159_vm4 = vcmp.ge.s32.totalorder %v572_v15, 7  ;;  %vm174_vm5 = vcmask 359424  }
  0x80   :  { %v72_v59 = vsel %vm55_vm3, %v70_v57, 0.0  ;;  %v51_v60 = vsel %vm34_vm6, %v49_v58, 0.0  ;;  %vm139_vm3 = vmand %vm138_vm1, %vm28_vm0  ;;  %vm243_vm1 = vcmp.ge.s32.totalorder %v572_v15, 11  ;;  %v365_v54 = vadd.s32 8, %v546_v2 }
  0x81   :  { %73 = vst [vmem:[%s808_s1 + $0x2] sm:$0x1] %v72_v59  ;;  %52 = vst [vmem:[%s808_s1 + $0x1] sm:$0x1] %v51_v60 }
  0x82   :  { %v89_v61 = vpop.permute.xlu1 %88  ;;  %v87_v62 = vpop.permute.xlu0 %86  ;;  %vm160_vm6 = vmand %vm159_vm4, %vm28_vm0  ;;  %vm264_vm4 = vcmp.ge.s32.totalorder %v572_v15, 12 }
  0x83   :  { %v91_v63 = vsel %vm90_vm8, %v87_v62, %v89_v61  ;;  %vm195_vm8 = vcmask 293888  }
  0x84   :  { %v93_v0 = vsel %vm76_vm9, %v91_v63, 0.0  ;;  %vm181_vm9 = vmand %vm180_vm7, %vm28_vm0  ;;  %vm285_vm7 = vcmp.ge.s32.totalorder %v572_v15, 13 }
  0x85   :  { %94 = vst [vmem:[%s808_s1 + $0x3] sm:$0x1] %v93_v0 }
  0x86   :  { %v110_v3 = vpop.permute.xlu1 %109  ;;  %v108_v4 = vpop.permute.xlu0 %107 }
  0x87   :  { %v112_v5 = vsel %vm111_vm11, %v108_v4, %v110_v3  ;;  %vm216_vm11 = vcmask 236544  }
  0x88   :  { %v114_v6 = vsel %vm97_vm12, %v112_v5, 0.0  ;;  %vm202_vm12 = vmand %vm201_vm10, %vm28_vm0  ;;  %vm306_vm10 = vcmp.ge.s32.totalorder %v572_v15, 14 }
  0x89   :  { %115 = vst [vmem:[%s808_s1 + $0x4] sm:$0x1] %v114_v6 }
  0x8a   :  { %v131_v7 = vpop.permute.xlu1 %130  ;;  %v129_v8 = vpop.permute.xlu0 %128 }
  0x8b   :  { %v133_v9 = vsel %vm132_vm14, %v129_v8, %v131_v7  ;;  %vm237_vm14 = vcmask 187392  }
  0x8c   :  { %v135_v10 = vsel %vm118_vm15, %v133_v9, 0.0  ;;  %vm223_vm15 = vmand %vm222_vm13, %vm28_vm0  ;;  %vm327_vm13 = vcmp.ge.s32.totalorder %v572_v15, 15 }
  0x8d   :  { %136 = vst [vmem:[%s808_s1 + $0x5] sm:$0x1] %v135_v10 }
  0x8e   :  { %v152_v11 = vpop.permute.xlu1 %151  ;;  %v150_v12 = vpop.permute.xlu0 %149 }
  0x8f   :  { %v154_v13 = vsel %vm153_vm2, %v150_v12, %v152_v11  ;;  %vm258_vm2 = vcmask 146432  }
  0x90   :  { %v156_v14 = vsel %vm139_vm3, %v154_v13, 0.0  ;;  %vm244_vm3 = vmand %vm243_vm1, %vm28_vm0  ;;  %vm429_vm1 = vcmp.eq.s32.totalorder %v365_v54, %v572_v15 }
  0x91   :  { %157 = vst [vmem:[%s808_s1 + $0x6] sm:$0x1] %v156_v14 }
  0x92   :  { %v173_v16 = vpop.permute.xlu1 %172  ;;  %v171_v17 = vpop.permute.xlu0 %170 }
  0x93   :  { %v175_v18 = vsel %vm174_vm5, %v171_v17, %v173_v16  ;;  %vm279_vm5 = vcmask 113664  }
  0x94   :  { %v177_v19 = vsel %vm160_vm6, %v175_v18, 0.0  ;;  %vm265_vm6 = vmand %vm264_vm4, %vm28_vm0 }
  0x95   :  { %178 = vst [vmem:[%s808_s1 + $0x7] sm:$0x1] %v177_v19 }
  0x96   :  { %v194_v20 = vpop.permute.xlu1 %193  ;;  %v192_v21 = vpop.permute.xlu0 %191 }
  0x97   :  { %v196_v22 = vsel %vm195_vm8, %v192_v21, %v194_v20  ;;  %vm300_vm8 = vcmask 89088  }
  0x98   :  { %v198_v23 = vsel %vm181_vm9, %v196_v22, 0.0  ;;  %vm286_vm9 = vmand %vm285_vm7, %vm28_vm0 }
  0x99   :  { %199 = vst [vmem:[%s808_s1 + $0x8] sm:$0x1] %v198_v23 }
  0x9a   :  { %v215_v24 = vpop.permute.xlu1 %214  ;;  %v213_v25 = vpop.permute.xlu0 %212 }
  0x9b   :  { %v217_v26 = vsel %vm216_vm11, %v213_v25, %v215_v24  ;;  %vm321_vm11 = vcmask 72704  }
  0x9c   :  { %v219_v27 = vsel %vm202_vm12, %v217_v26, 0.0  ;;  %v695_v28 = vld [vmem:[%s808_s1] sm:$0xff]  ;;  %vm307_vm12 = vmand %vm306_vm10, %vm28_vm0 }
  0x9d   :  { %220 = vst [vmem:[%s808_s1 + $0x9] sm:$0x1] %v219_v27  ;;  %380 = vxpose.xlu0.b32.start [1/16] %v695_v28, 128 }
  0x9e   :  { %v236_v29 = vpop.permute.xlu1 %235  ;;  %v234_v30 = vpop.permute.xlu0 %233 }
  0x9f   :  { %v238_v31 = vsel %vm237_vm14, %v234_v30, %v236_v29  ;;  %vm342_vm14 = vcmask 64512  }
  0xa0   :  { %v240_v32 = vsel %vm223_vm15, %v238_v31, 0.0  ;;  %vm328_vm15 = vmand %vm327_vm13, %vm28_vm0  ;;  %vm428_vm0 = vcmp.eq.s32.totalorder %v546_v2, %v572_v15 }
  0xa1   :  { %241 = vst [vmem:[%s808_s1 + $0xa] sm:$0x1] %v240_v32  ;;  %v444_v57 = vsel %vm428_vm0, %v695_v28, 0.0 }
  0xa2   :  { %v257_v33 = vpop.permute.xlu1 %256  ;;  %v255_v34 = vpop.permute.xlu0 %254 }
  0xa3   :  { %v259_v35 = vsel %vm258_vm2, %v255_v34, %v257_v33 }
  0xa4   :  { %v261_v36 = vsel %vm244_vm3, %v259_v35, 0.0 }
  0xa5   :  { %262 = vst [vmem:[%s808_s1 + $0xb] sm:$0x1] %v261_v36 }
  0xa6   :  { %v278_v37 = vpop.permute.xlu1 %277  ;;  %v276_v38 = vpop.permute.xlu0 %275 }
  0xa7   :  { %v280_v39 = vsel %vm279_vm5, %v276_v38, %v278_v37 }
  0xa8   :  { %v282_v40 = vsel %vm265_vm6, %v280_v39, 0.0 }
  0xa9   :  { %283 = vst [vmem:[%s808_s1 + $0xc] sm:$0x1] %v282_v40 }
  0xaa   :  { %v299_v41 = vpop.permute.xlu1 %298  ;;  %v297_v42 = vpop.permute.xlu0 %296 }
  0xab   :  { %v301_v43 = vsel %vm300_vm8, %v297_v42, %v299_v41 }
  0xac   :  { %v303_v44 = vsel %vm286_vm9, %v301_v43, 0.0 }
  0xad   :  { %304 = vst [vmem:[%s808_s1 + $0xd] sm:$0x1] %v303_v44 }
  0xae   :  { %v320_v45 = vpop.permute.xlu1 %319  ;;  %v318_v46 = vpop.permute.xlu0 %317 }
  0xaf   :  { %v322_v47 = vsel %vm321_vm11, %v318_v46, %v320_v45 }
  0xb0   :  { %v324_v48 = vsel %vm307_vm12, %v322_v47, 0.0 }
  0xb1   :  { %325 = vst [vmem:[%s808_s1 + $0xe] sm:$0x1] %v324_v48 }
  0xb2   :  { %v341_v49 = vpop.permute.xlu1 %340  ;;  %v339_v50 = vpop.permute.xlu0 %338 }
  0xb3   :  { %v343_v51 = vsel %vm342_vm14, %v339_v50, %v341_v49 }
  0xb4   :  { %v345_v52 = vsel %vm328_vm15, %v343_v51, 0.0 }
  0xb5   :  { %346 = vst [vmem:[%s808_s1 + $0xf] sm:$0x1] %v345_v52 }
  0xbc   :  { %v348_v53 = vld [vmem:[%s808_s1 + $0x8] sm:$0xff] }
  0xbd   :  { %381 = vxpose.xlu0.b32.cont [2/16] %v348_v53, 128 }
  0xc1   :  { %382 = vxpose.xlu0.b32.cont [3/16] %v512_v1, 128 }
  0xc5   :  { %383 = vxpose.xlu0.b32.cont [4/16] %v512_v1, 128 }
  0xc9   :  { %384 = vxpose.xlu0.b32.cont [5/16] %v512_v1, 128 }
  0xcd   :  { %385 = vxpose.xlu0.b32.cont [6/16] %v512_v1, 128 }
  0xd1   :  { %386 = vxpose.xlu0.b32.cont [7/16] %v512_v1, 128 }
  0xd5   :  { %387 = vxpose.xlu0.b32.cont [8/16] %v512_v1, 128 }
  0xd9   :  { %388 = vxpose.xlu0.b32.cont [9/16] %v512_v1, 128 }
  0xdd   :  { %389 = vxpose.xlu0.b32.cont [10/16] %v512_v1, 128 }
  0xe1   :  { %390 = vxpose.xlu0.b32.cont [11/16] %v512_v1, 128 }
  0xe5   :  { %391 = vxpose.xlu0.b32.cont [12/16] %v512_v1, 128 }
  0xe9   :  { %392 = vxpose.xlu0.b32.cont [13/16] %v512_v1, 128 }
  0xed   :  { %393 = vxpose.xlu0.b32.cont [14/16] %v512_v1, 128 }
  0xf1   :  { %394 = vxpose.xlu0.b32.cont [15/16] %v512_v1, 128 }
  0xf5   :  { %395 = vxpose.xlu0.b32.end [16/16] %v512_v1, 128  ;;  %v445_v1 = vsel %vm429_vm1, %v348_v53, 0.0 }
 0x135   :  { %v396_v55 = vpop.trf.xlu0 }
 0x136   :  { %v412_v56 = vadd.f32 %v396_v55, %v695_v28 }
 0x138   :  { %v460_v58 = vsub.f32 %v412_v56, %v444_v57 }
 0x139   :  { %v397_v59 = vpop.trf.xlu0 }
 0x13a   :  { %476 = vst [vmem:[%s808_s1] sm:$0xff] %v460_v58  ;;  %v413_v60 = vadd.f32 %v397_v59, %v348_v53 }
 0x13c   :  { %v461_v61 = vsub.f32 %v413_v60, %v445_v1 }
 0x13d   :  { %v398_v62 = vpop.trf.xlu0 }
 0x13e   :  { %477 = vst [vmem:[%s808_s1 + $0x8] sm:$0xff] %v461_v61  ;;  %478 = vst [vmem:[%s808_s1 + $0x10] sm:$0xff] %v398_v62 }
 0x141   :  { %v399_v2 = vpop.trf.xlu0 }
 0x142   :  { %479 = vst [vmem:[%s808_s1 + $0x18] sm:$0xff] %v399_v2 }
 0x145   :  { %v400_v63 = vpop.trf.xlu0 }
 0x146   :  { %480 = vst [vmem:[%s808_s1 + $0x20] sm:$0xff] %v400_v63 }
 0x149   :  { %v401_v15 = vpop.trf.xlu0 }
 0x14a   :  { %481 = vst [vmem:[%s808_s1 + $0x28] sm:$0xff] %v401_v15 }
 0x14d   :  { %v402_v0 = vpop.trf.xlu0 }
 0x14e   :  { %482 = vst [vmem:[%s808_s1 + $0x30] sm:$0xff] %v402_v0 }
 0x151   :  { %v403_v3 = vpop.trf.xlu0 }
 0x152   :  { %483 = vst [vmem:[%s808_s1 + $0x38] sm:$0xff] %v403_v3 }
 0x155   :  { %v404_v4 = vpop.trf.xlu0 }
 0x156   :  { %484 = vst [vmem:[%s808_s1 + $0x40] sm:$0xff] %v404_v4 }
 0x159   :  { %v405_v5 = vpop.trf.xlu0 }
 0x15a   :  { %485 = vst [vmem:[%s808_s1 + $0x48] sm:$0xff] %v405_v5 }
 0x15d   :  { %v406_v6 = vpop.trf.xlu0 }
 0x15e   :  { %486 = vst [vmem:[%s808_s1 + $0x50] sm:$0xff] %v406_v6 }
 0x161   :  { %v407_v7 = vpop.trf.xlu0 }
 0x162   :  { %487 = vst [vmem:[%s808_s1 + $0x58] sm:$0xff] %v407_v7 }
 0x165   :  { %v408_v8 = vpop.trf.xlu0 }
 0x166   :  { %488 = vst [vmem:[%s808_s1 + $0x60] sm:$0xff] %v408_v8 }
 0x169   :  { %v409_v9 = vpop.trf.xlu0 }
 0x16a   :  { %489 = vst [vmem:[%s808_s1 + $0x68] sm:$0xff] %v409_v9 }
 0x16d   :  { %v410_v10 = vpop.trf.xlu0 }
 0x16e   :  { %490 = vst [vmem:[%s808_s1 + $0x70] sm:$0xff] %v410_v10 }
 0x171   :  { %v411_v11 = vpop.trf.xlu0 }
 0x172   :  { %491 = vst [vmem:[%s808_s1 + $0x78] sm:$0xff] %v411_v11 }

</bundles_post_ra>
